<compile_context>
chip_gen: v7x
topology: tpu7x:2x2x1
jax: 0.10.0
libtpu: 0.0.40
codegen_flags: <defaults>
</compile_context>

<pallas_src>
import functools

import jax
import jax.numpy as jnp
from jax.experimental import pallas as pl
from jax.experimental.pallas import tpu as pltpu

VOCAB_SIZE = 65          # "65 tokens in the vocabulary" per the module docstring
NUM_EMBEDDINGS = 32
CONTEXT_LENGTH = 8

LANE = 128               # TPU lane width


def _round_up(x, m):
    return (x + m - 1) // m * m


def bigram_kernel(ids_ref, tgt_ref, w_ref, logits_ref, nll_ref,
                  *, n_valid, vocab, seq_len):
    """One grid step handles TILE_N flattened (B*T) rows.

    ids_ref    : (TILE_N, 1)     int32  token ids
    tgt_ref    : (TILE_N, 1)     int32  targets
    w_ref      : (K_PAD, V_PAD)  bf16   folded [tok_tab@W^T ; pos_tab@W^T ; bias ; 0]
    logits_ref : (TILE_N, V_PAD) f32    lane-dense logits output
    nll_ref    : (TILE_N, 1)     f32    per-row NLL (0 for padded rows)
    """
    tile_n = ids_ref.shape[0]
    k_pad, v_pad = w_ref.shape
    f32 = jnp.float32
    bias_lane = vocab + seq_len                                           # always-on lane

    # Global row index of each row in this tile; flat n = b*T + t  =>  pos = n % T.
    row0 = pl.program_id(0) * tile_n
    grow = row0 + jax.lax.broadcasted_iota(jnp.int32, (tile_n, 1), 0)     # (TILE_N, 1)
    pos_col = vocab + grow % seq_len                                      # in [V, V+T)

    # Fused one-hot: token lane, position lane, and bias lane never collide.
    lane = jax.lax.broadcasted_iota(jnp.int32, (tile_n, k_pad), 1)        # (TILE_N, K_PAD)
    onehot = ((lane == ids_ref[...]) | (lane == pos_col) | (lane == bias_lane))
    onehot = onehot.astype(jnp.bfloat16)                                  # exact 0/1 MXU operand

    # Single MXU pass: logits = onehot @ [W_tok; W_pos; b; 0] (f32 accumulate).
    # Bias + the -1e30 vocab-padding mask ride along in the bias row of the table.
    logits = jnp.dot(onehot, w_ref[...], preferred_element_type=f32)
    logits_ref[...] = logits                                              # lane-dense store

    # Cross entropy per row, numerically-stable log-sum-exp in f32.
    m = jnp.max(logits, axis=-1, keepdims=True)                           # pad lanes ~ -1e30
    lse = m + jnp.log(jnp.sum(jnp.exp(logits - m), axis=-1, keepdims=True))
    lane_v = lane if v_pad == k_pad else jax.lax.broadcasted_iota(
        jnp.int32, (tile_n, v_pad), 1)
    picked = jnp.sum(jnp.where(lane_v == tgt_ref[...], logits, 0.0),
                     axis=-1, keepdims=True)                              # (TILE_N, 1)
    # Zero the NLL of rows that only exist because N was padded to the tile size.
    nll_ref[...] = jnp.where(grow < n_valid, lse - picked, 0.0)


@functools.partial(jax.jit, static_argnames=("tile_n",))
def bigram_forward(inputs, targets, params, *, tile_n=512):
    """inputs, targets: (B, T) int token ids.

    Returns (logits_flat (B*T, V) f32, loss scalar) — matching PyTorch, which
    returns the flattened (B*T, V) logits view when targets are given.
    """
    tok_tab, pos_tab, w, b = params
    B, T = inputs.shape
    V, _E = tok_tab.shape
    N = B * T

    # ---- fold embeddings + bias into one lm_head table (once, outside the kernel) ----
    hi = jax.lax.Precision.HIGHEST
    w_t = w.T.astype(jnp.float32)                                         # (E, V)
    w_tok = jnp.dot(tok_tab.astype(jnp.float32), w_t, precision=hi)       # (V, V)
    w_pos = jnp.dot(pos_tab.astype(jnp.float32), w_t, precision=hi)       # (T, V)

    v_pad = _round_up(V, LANE)                                            # 65      -> 128
    k_pad = _round_up(V + T + 1, LANE)                                    # 65+8+1  -> 128
    bias_row = jnp.full((v_pad,), -1e30, jnp.float32).at[:V].set(b.astype(jnp.float32))
    w_comb = jnp.zeros((k_pad, v_pad), jnp.float32)
    w_comb = (w_comb.at[:V, :V].set(w_tok)
                    .at[V:V + T, :V].set(w_pos)
                    .at[V + T, :].set(bias_row))
    w_comb = w_comb.astype(jnp.bfloat16)                                  # MXU operand

    # ---- tile the flattened row dimension ----
    tile_n = min(tile_n, _round_up(N, 8))        # small tiles stay well under VMEM limits
    n_pad = _round_up(N, tile_n)
    grid = (n_pad // tile_n,)
    ids2 = jnp.pad(inputs.reshape(N).astype(jnp.int32), (0, n_pad - N)).reshape(n_pad, 1)
    tgt2 = jnp.pad(targets.reshape(N).astype(jnp.int32), (0, n_pad - N)).reshape(n_pad, 1)

    kernel = functools.partial(bigram_kernel, n_valid=N, vocab=V, seq_len=T)
    logits_pad, nll = pl.pallas_call(
        kernel,
        out_shape=(
            jax.ShapeDtypeStruct((n_pad, v_pad), jnp.float32),
            jax.ShapeDtypeStruct((n_pad, 1), jnp.float32),
        ),
        grid=grid,
        in_specs=[
            pl.BlockSpec((tile_n, 1), lambda i: (i, 0)),        # token ids
            pl.BlockSpec((tile_n, 1), lambda i: (i, 0)),        # targets
            pl.BlockSpec((k_pad, v_pad), lambda i: (0, 0)),     # folded table (VMEM-resident)
        ],
        out_specs=(
            pl.BlockSpec((tile_n, v_pad), lambda i: (i, 0)),    # lane-dense logits
            pl.BlockSpec((tile_n, 1), lambda i: (i, 0)),        # per-row NLL
        ),
        compiler_params=pltpu.CompilerParams(
            dimension_semantics=("parallel",),   # shard row tiles across TensorCores
            vmem_limit_bytes=32 * 1024 * 1024,
        ),
    )(ids2, tgt2, w_comb)

    logits = logits_pad[:N, :V]                  # drop vocab padding + row padding
    loss = jnp.sum(nll) / N                      # padded rows already zeroed in-kernel
    return logits, loss


def init_params(key):
    k1, k2, k3, k4 = jax.random.split(key, 4)
    tok_tab = jax.random.normal(k1, (VOCAB_SIZE, NUM_EMBEDDINGS), jnp.float32)   # nn.Embedding ~ N(0,1)
    pos_tab = jax.random.normal(k2, (CONTEXT_LENGTH, NUM_EMBEDDINGS), jnp.float32)
    bound = 1.0 / (NUM_EMBEDDINGS ** 0.5)                                        # nn.Linear default init
    w = jax.random.uniform(k3, (VOCAB_SIZE, NUM_EMBEDDINGS), jnp.float32, -bound, bound)
    b = jax.random.uniform(k4, (VOCAB_SIZE,), jnp.float32, -bound, bound)
    return tok_tab, pos_tab, w, b


def reference_forward(inputs, targets, params):
    tok_tab, pos_tab, w, b = params
    B, T = inputs.shape
    x = tok_tab[inputs] + pos_tab[jnp.arange(T)][None, :, :]
    logits = jnp.einsum("btd,vd->btv", x, w,
                        precision=jax.lax.Precision.HIGHEST) + b
    logits = logits.reshape(-1, logits.shape[-1])
    tgt = targets.reshape(-1)
    logz = jax.scipy.special.logsumexp(logits, axis=-1)
    loss = jnp.mean(logz - logits[jnp.arange(logits.shape[0]), tgt])
    return logits, loss


if __name__ == "__main__":
    key = jax.random.PRNGKey(0)
    k_params, k_in, k_tg = jax.random.split(key, 3)
    params = init_params(k_params)

    B, T = 2, CONTEXT_LENGTH
    inputs = jax.random.randint(k_in, (B, T), 0, VOCAB_SIZE, jnp.int32)
    targets = jax.random.randint(k_tg, (B, T), 0, VOCAB_SIZE, jnp.int32)

    logits, loss = bigram_forward(inputs, targets, params)
    jax.block_until_ready((logits, loss))

    ref_logits, ref_loss = reference_forward(inputs, targets, params)
    # Tolerance reflects bf16 MXU weights (folded table); CE math itself is f32.
    assert jnp.allclose(logits, ref_logits, rtol=2e-2, atol=2e-2), \
        float(jnp.max(jnp.abs(logits - ref_logits)))
    assert jnp.allclose(loss, ref_loss, rtol=2e-2, atol=2e-2), \
        (float(loss), float(ref_loss))

    # TODO(synk): generate() uses torch.multinomial sampling — an autoregressive
    # host-side inference loop, not part of the forward-pass kernel, so it is not ported.
    print("KERNEL_OK")
</pallas_src>

<mosaic_0001>
module attributes {stable_mosaic.version = 11 : i64} {
  func.func @bigram_kernel(%arg0: i32, %arg1: memref<16x1xi32, #tpu.memory_space<vmem>>, %arg2: memref<16x1xi32, #tpu.memory_space<vmem>>, %arg3: memref<128x128xbf16, #tpu.memory_space<vmem>>, %arg4: memref<16x128xf32, #tpu.memory_space<vmem>>, %arg5: memref<16x1xf32, #tpu.memory_space<vmem>>) attributes {dimension_semantics = [#tpu.dimension_semantics<parallel>], iteration_bounds = array<i64: 1>, scalar_prefetch = 0 : i64, scratch_operands = 0 : i64, tpu.core_type = #tpu.core_type<tc>, window_params = [{transform_indices = @transform_0, window_bounds = array<i64: 16, 1>}, {transform_indices = @transform_1, window_bounds = array<i64: 16, 1>}, {pipeline_mode = #tpu.pipeline_mode<synchronous>, transform_indices = @transform_2, window_bounds = array<i64: 128, 128>}, {transform_indices = @transform_3, window_bounds = array<i64: 16, 128>}, {transform_indices = @transform_4, window_bounds = array<i64: 16, 1>}]} {
    %c16_i32 = arith.constant 16 : i32
    %0 = arith.muli %arg0, %c16_i32 : i32
    %1 = tpu.iota {dimensions = array<i32: 0>} : vector<16x1xi32>
    %2 = vector.broadcast %0 : i32 to vector<16x1xi32>
    %3 = arith.addi %2, %1 : vector<16x1xi32>
    %c8_i32 = arith.constant 8 : i32
    %c0_i32 = arith.constant 0 : i32
    %4 = arith.cmpi eq, %c8_i32, %c0_i32 : i32
    %c1_i32 = arith.constant 1 : i32
    %5 = arith.select %4, %c1_i32, %c8_i32 : i32
    %6 = vector.broadcast %5 : i32 to vector<16x1xi32>
    %7 = arith.remsi %3, %6 : vector<16x1xi32>
    %c0_i32_0 = arith.constant 0 : i32
    %8 = vector.broadcast %c0_i32_0 : i32 to vector<16x1xi32>
    %9 = arith.cmpi ne, %7, %8 : vector<16x1xi32>
    %c0_i32_1 = arith.constant 0 : i32
    %10 = vector.broadcast %c0_i32_1 : i32 to vector<16x1xi32>
    %11 = arith.cmpi slt, %7, %10 : vector<16x1xi32>
    %c0_i32_2 = arith.constant 0 : i32
    %12 = arith.cmpi slt, %5, %c0_i32_2 : i32
    %13 = vector.broadcast %12 : i1 to vector<16x1xi1>
    %14 = vector.broadcast %13 : vector<16x1xi1> to vector<16x1xi1>
    %15 = arith.xori %11, %14 : vector<16x1xi1>
    %16 = arith.andi %15, %9 : vector<16x1xi1>
    %17 = vector.broadcast %5 : i32 to vector<16x1xi32>
    %18 = arith.addi %7, %17 : vector<16x1xi32>
    %19 = arith.select %16, %18, %7 : vector<16x1xi1>, vector<16x1xi32>
    %c65_i32 = arith.constant 65 : i32
    %20 = vector.broadcast %c65_i32 : i32 to vector<16x1xi32>
    %21 = arith.addi %20, %19 : vector<16x1xi32>
    %22 = tpu.iota {dimensions = array<i32: 1>} : vector<16x128xi32>
    %c0 = arith.constant 0 : index
    %c0_3 = arith.constant 0 : index
    %23 = vector.load %arg1[%c0, %c0_3] : memref<16x1xi32, #tpu.memory_space<vmem>>, vector<16x1xi32>
    %24 = vector.broadcast %23 : vector<16x1xi32> to vector<16x128xi32>
    %25 = arith.cmpi eq, %22, %24 : vector<16x128xi32>
    %26 = vector.broadcast %21 : vector<16x1xi32> to vector<16x128xi32>
    %27 = arith.cmpi eq, %22, %26 : vector<16x128xi32>
    %28 = arith.ori %25, %27 : vector<16x128xi1>
    %c73_i32 = arith.constant 73 : i32
    %29 = vector.broadcast %c73_i32 : i32 to vector<16x128xi32>
    %30 = arith.cmpi eq, %22, %29 : vector<16x128xi32>
    %31 = arith.ori %28, %30 : vector<16x128xi1>
    %32 = arith.extui %31 : vector<16x128xi1> to vector<16x128xi32>
    %33 = arith.sitofp %32 : vector<16x128xi32> to vector<16x128xf32>
    %34 = arith.truncf %33 : vector<16x128xf32> to vector<16x128xbf16>
    %c0_4 = arith.constant 0 : index
    %c0_5 = arith.constant 0 : index
    %35 = vector.load %arg3[%c0_4, %c0_5] : memref<128x128xbf16, #tpu.memory_space<vmem>>, vector<128x128xbf16>
    %cst = arith.constant dense<0.000000e+00> : vector<16x128xf32>
    %36 = tpu.matmul %34, %35, %cst {dimension_numbers = #tpu.dot_dimension_numbers<[1], [0], [0], [1], [0, 0, 1, 1], [], []>} : vector<16x128xbf16>, vector<128x128xbf16>, vector<16x128xf32> -> vector<16x128xf32>
    %c0_6 = arith.constant 0 : index
    %c0_7 = arith.constant 0 : index
    %37 = vector.load %arg4[%c0_6, %c0_7] : memref<16x128xf32, #tpu.memory_space<vmem>>, vector<16x128xf32>
    tpu.vector_store %arg4[%c0_6, %c0_7], %36 {strides = array<i32>} : memref<16x128xf32, #tpu.memory_space<vmem>>, vector<16x128xf32>,
    %cst_8 = arith.constant dense<0xFF800000> : vector<16xf32>
    %38 = vector.multi_reduction <maximumf>, %36, %cst_8 [1] : vector<16x128xf32> to vector<16xf32>
    %39 = vector.shape_cast %38 : vector<16xf32> to vector<16x1xf32>
    %40 = vector.broadcast %39 : vector<16x1xf32> to vector<16x128xf32>
    %41 = arith.subf %36, %40 : vector<16x128xf32>
    %42 = math.exp %41 : vector<16x128xf32>
    %cst_9 = arith.constant dense<0.000000e+00> : vector<16xf32>
    %43 = vector.multi_reduction <add>, %42, %cst_9 [1] : vector<16x128xf32> to vector<16xf32>
    %44 = vector.shape_cast %43 : vector<16xf32> to vector<16x1xf32>
    %45 = math.log %44 : vector<16x1xf32>
    %46 = arith.addf %39, %45 : vector<16x1xf32>
    %c0_10 = arith.constant 0 : index
    %c0_11 = arith.constant 0 : index
    %47 = vector.load %arg2[%c0_10, %c0_11] : memref<16x1xi32, #tpu.memory_space<vmem>>, vector<16x1xi32>
    %48 = vector.broadcast %47 : vector<16x1xi32> to vector<16x128xi32>
    %49 = arith.cmpi eq, %22, %48 : vector<16x128xi32>
    %cst_12 = arith.constant 0.000000e+00 : f32
    %50 = vector.broadcast %cst_12 : f32 to vector<16x128xf32>
    %51 = arith.select %49, %36, %50 : vector<16x128xi1>, vector<16x128xf32>
    %cst_13 = arith.constant dense<0.000000e+00> : vector<16xf32>
    %52 = vector.multi_reduction <add>, %51, %cst_13 [1] : vector<16x128xf32> to vector<16xf32>
    %53 = vector.shape_cast %52 : vector<16xf32> to vector<16x1xf32>
    %c16_i32_14 = arith.constant 16 : i32
    %54 = vector.broadcast %c16_i32_14 : i32 to vector<16x1xi32>
    %55 = arith.cmpi slt, %3, %54 : vector<16x1xi32>
    %56 = arith.subf %46, %53 : vector<16x1xf32>
    %cst_15 = arith.constant 0.000000e+00 : f32
    %57 = vector.broadcast %cst_15 : f32 to vector<16x1xf32>
    %58 = arith.select %55, %56, %57 : vector<16x1xi1>, vector<16x1xf32>
    %c0_16 = arith.constant 0 : index
    %c0_17 = arith.constant 0 : index
    %59 = vector.load %arg5[%c0_16, %c0_17] : memref<16x1xf32, #tpu.memory_space<vmem>>, vector<16x1xf32>
    tpu.vector_store %arg5[%c0_16, %c0_17], %58 {strides = array<i32>} : memref<16x1xf32, #tpu.memory_space<vmem>>, vector<16x1xf32>,
    return
  }
  func.func @transform_0(%arg0: i32) -> (i32, i32) {
    %c0_i32 = arith.constant 0 : i32
    %c0_i32_0 = arith.constant 0 : i32
    return %arg0, %c0_i32 : i32, i32
  }
  func.func @transform_1(%arg0: i32) -> (i32, i32) {
    %c0_i32 = arith.constant 0 : i32
    %c0_i32_0 = arith.constant 0 : i32
    return %arg0, %c0_i32 : i32, i32
  }
  func.func @transform_2(%arg0: i32) -> (i32, i32) {
    %c0_i32 = arith.constant 0 : i32
    %c0_i32_0 = arith.constant 0 : i32
    %c0_i32_1 = arith.constant 0 : i32
    return %c0_i32, %c0_i32_0 : i32, i32
  }
  func.func @transform_3(%arg0: i32) -> (i32, i32) {
    %c0_i32 = arith.constant 0 : i32
    %c0_i32_0 = arith.constant 0 : i32
    return %arg0, %c0_i32 : i32, i32
  }
  func.func @transform_4(%arg0: i32) -> (i32, i32) {
    %c0_i32 = arith.constant 0 : i32
    %c0_i32_0 = arith.constant 0 : i32
    return %arg0, %c0_i32 : i32, i32
  }
}

</mosaic_0001>

<bundles_post_ra>
// kernel: bigram_forward.1
= control target key start
LH: loop header
LB: loop body
LE: loop exit
PB: predicated region body
PF: predicated region fallthrough
CT: control target
= control target key end

     0   :  { %v337_v1 = vmov 0   ;;  %v338_v2 = vmov 0.0   ;;  %vm339_vm0 = vmmov 0   ;;  %s423_s0 = inlined_call_operand.vmem [shape: s32[16,1], index: 0, kind: input, shape index: {}]   ;;  %s424_s1 = inlined_call_operand.vmem [shape: s32[16,1], index: 1, kind: input, shape index: {}]   ;;  %s425_s2 = inlined_call_operand.vmem [shape: bf16[128,128], index: 2, kind: input, shape index: {}]   ;;  %s426_s3 = inlined_call_operand.hbm [shape: f32[16,128], index: 3, kind: output, shape index: {0}]   ;;  %s427_s4 = inlined_call_operand.vmem [shape: f32[16,1], index: 4, kind: output, shape index: {1}]  }
   0x1   :  { %v53_v0 = vld [vmem:[%s423_s0] sm:$0xff]  ;;  %295 = vset.pattern.permute.xlu0 %v337_v1  ;;  %268 = vmatprep.subr.bf16.mxu0 %v338_v2  ;;  %v54_v4 = vld [vmem:[%s423_s0 + $0x8] sm:$0xff]  ;;  %v299_v7 = vld [vmem:[%s425_s2 + $0x10] sm:$0xff]  }
   0x2   :  { %v297_v3 = vld [vmem:[%s425_s2] sm:$0xff]   ;;  %56 = vperm.xlu0 %295, %v53_v0   ;;  %296 = vset.pattern.permute.xlu1 %v337_v1  ;;  %v298_v5 = vld [vmem:[%s425_s2 + $0x8] sm:$0xff]  }
   0x3   :  { %269 = vmatpush3.bf16.msra.mxu0 %v297_v3  ;;  %v202_v6 = vld [vmem:[%s424_s1] sm:$0xff]  ;;  %284 = vmatprep.mubr.msk.bf16.mxu0 %vm339_vm0, %v338_v2 }
   0x4   :  { %270 = vmatprep.subr.bf16.mxu0 %v338_v2 }
   0x6   :  { %59 = vperm.xlu0 %295, %v54_v4  }
   0x7   :  { %271 = vmatpush3.bf16.msra.mxu0 %v298_v5 }
   0x8   :  { %272 = vmatprep.subr.bf16.mxu0 %v338_v2 }
   0x9   :  { %10 = vsyncpa [#allocation3], 0  ;;  %v300_v8 = vld [vmem:[%s425_s2 + $0x18] sm:$0xff]   ;;  %v301_v9 = vld [vmem:[%s425_s2 + $0x20] sm:$0xff]   ;;  %v19_v13 = vlaneseq  ;;  %v340_v23 = vmov 1.0|1.0  }
   0xa   :  { %205 = vperm.xlu0 %295, %v202_v6   ;;  %v302_v10 = vld [vmem:[%s425_s2 + $0x28] sm:$0xff]   ;;  %v303_v11 = vld [vmem:[%s425_s2 + $0x30] sm:$0xff]   ;;  %v304_v12 = vld [vmem:[%s425_s2 + $0x38] sm:$0xff]  }
   0xb   :  { %273 = vmatpush3.bf16.msra.mxu0 %v299_v7  ;;  %v20_v14 = vshrl.u32 %v19_v13, 7  ;;  %v52_v18 = vand.u32 127, %v19_v13  ;;  %v203_v28 = vld [vmem:[%s424_s1 + $0x8] sm:$0xff]  ;;  %s341_s1 = smov [#allocation2]  }
   0xc   :  { %274 = vmatprep.subr.bf16.mxu0 %v338_v2  ;;  %s232_s11 = sshll.u32 %s341_s1, 4  ;;  %s233_s11 = int_to_ptr.vmem [resolvable:$true] %s232_s11 }
   0xd   :  { %v29_v15 = vand.u32 7, %v20_v14  ;;  %v21_v16 = vadd.s32 8, %v20_v14  ;;  %vm67_vm4 = vcmp.eq.s32.totalorder %v52_v18, 73  ;;  %s313_s12 = scalar_lea.vmem %s233_s11, 256  ;;  %p318_p1 = scmp.lt.s32.totalorder %s233_s11, %s233_s11 }
   0xe   :  { %p314_p0 = scmp.ne.s32.totalorder %s233_s11, %s313_s12  ;;  %p319_p2 = scmp.lt.s32.totalorder %s313_s12, %s313_s12 }
   0xf   :  { %275 = vmatpush3.bf16.msra.mxu0 %v300_v8  ;;  %v49_v17 = vadd.s32 65, %v29_v15  ;;  %v36_v19 = vand.u32 7, %v21_v16 }
  0x10   :  { %276 = vmatprep.subr.bf16.mxu0 %v338_v2  ;;  %p320_p3 = por %p319_p2, %p318_p1 }
  0x11   :  { %vm63_vm1 = vcmp.eq.s32.totalorder %v52_v18, %v49_v17  ;;  %v50_v20 = vadd.s32 65, %v36_v19 }
  0x12   :  { %p321_p4 = pnand %p320_p3, %p314_p0 }
  0x13   :  { %277 = vmatpush3.bf16.msra.mxu0 %v301_v9  ;;  %vm64_vm5 = vcmp.eq.s32.totalorder %v52_v18, %v50_v20 }
  0x14   :  { %278 = vmatprep.subr.bf16.mxu0 %v338_v2 }
  0x17   :  { %279 = vmatpush3.bf16.msra.mxu0 %v302_v10 }
  0x18   :  { %280 = vmatprep.subr.bf16.mxu0 %v338_v2 }
  0x1b   :  { %281 = vmatpush3.bf16.msra.mxu0 %v303_v11 }
  0x1c   :  { %282 = vmatprep.subr.bf16.mxu0 %v338_v2 }
  0x1f   :  { %283 = vmatpush3.bf16.msra.mxu0 %v304_v12 }
  0x81   :  { %v57_v21 = vpop.permute.xlu0 %56 }
  0x82   :  { %vm61_vm2 = vcmp.eq.s32.totalorder %v52_v18, %v57_v21 }
  0x83   :  { %vm65_vm3 = vmor %vm61_vm2, %vm63_vm1 }
  0x84   :  { %vm68_vm6 = vmor %vm65_vm3, %vm67_vm4 }
  0x85   :  { %v60_v22 = vpop.permute.xlu0 %59 }
  0x86   :  { %vm62_vm7 = vcmp.eq.s32.totalorder %v52_v18, %v60_v22 }
  0x87   :  { %vm66_vm8 = vmor %vm62_vm7, %vm64_vm5 }
  0x88   :  { %vm69_vm9 = vmor %vm66_vm8, %vm67_vm4 }
  0x89   :  { %vm257_vm10 = vmpackc.low %vm69_vm9, %vm68_vm6  ;;  %v206_v36 = vpop.permute.xlu0 %205 }
  0x8a   :  { %285 = vmatmul.mubr.msk.bf16.vlgmr.msra.gmra.mrb[0].mxu0 %vm257_vm10, %v340_v23  ;;  %vm210_vm11 = vcmp.eq.s32.totalorder %v52_v18, %v206_v36 }
 0x15d   :  { %v173_v24 = vpop.f32.mrb[0].mxu0 }
 0x15e   :  { %180 = vst [vmem:[#allocation2] sm:$0xff] %v173_v24  ;;  %182 = vmax.xlane.f32.xlu1 %v173_v24  ;;  %v286_v25 = vpop.f32.mrb[1].mxu0  ;;  %v212_v39 = vsel %vm210_vm11, %v173_v24, 0.0 }
 0x15f   :  { %v176_v26 = vpop.f32.mrb[2].mxu0 }
 0x160   :  { %181 = vst [vmem:[#allocation2 + $0x8] sm:$0xff] %v176_v26  ;;  %v287_v27 = vpop.f32.mrb[3].mxu0 }
 0x162   :  { %184 = vmax.xlane.f32.xlu1 %v176_v26 }
 0x173   :  { %208 = vperm.xlu1 %296, %v203_v28  }
 0x1eb   :  { %v183_v29 = vpop.xlane.xlu1 %182 }
 0x1ec   :  { %v186_v30 = vsub.f32 %v173_v24, %v183_v29 }
 0x1ee   :  { %v188_v31 = vmul.f32 1.442695, %v186_v30 }
 0x1ef   :  { %v185_v32 = vpop.xlane.xlu1 %184 }
 0x1f0   :  { %305 = vpow2.f32 %v188_v31  ;;  %v187_v33 = vsub.f32 %v176_v26, %v185_v32 }
 0x1f2   :  { %v190_v34 = vmul.f32 1.442695, %v187_v33 }
 0x1f3   :  { %v209_v37 = vpop.permute.xlu1 %208 }
 0x1f4   :  { %307 = vpow2.f32 %v190_v34  ;;  %vm211_vm12 = vcmp.eq.s32.totalorder %v52_v18, %v209_v37 }
 0x1f5   :  { %v213_v40 = vsel %vm211_vm12, %v176_v26, 0.0 }
 0x1fa   :  { %v306_v35 = vpop.eup %305 }
 0x1fb   :  { %192 = vadd.xlane.f32.xlu0 %v306_v35 }
 0x1fe   :  { %v308_v38 = vpop.eup %307 }
 0x1ff   :  { %214 = vadd.xlane.f32.xlu0 %v212_v39  ;;  %194 = vadd.xlane.f32.xlu1 %v308_v38 }
 0x203   :  { %216 = vadd.xlane.f32.xlu0 %v213_v40 }
 0x204   :  { %324 = shalt.err (!%p321_p4)
}
 0x205   :  { %s325_s15 = scalar_lea.hbm %s426_s3, 256 }
 0x206   :  { %p326_p5 = scmp.ne.s32.totalorder %s426_s3, %s325_s15  ;;  %p329_p6 = scmp.lt.u32.totalorder %s325_s15, %s426_s3 }
 0x208   :  { %p331_p7 = pnand %p329_p6, %p326_p5 }
 0x20a   :  { %334 = shalt.err (!%p331_p7)
}
 0x20b   :  { %s342_s20 = smov 128   ;;  %s343_s21 = smov 8   ;;  %vm224_vm13 = vcmask 7168  }
 0x20c   :  { %238 = dma.vmem_to_hbm [thread:$0]  %s233_s11, 256, %s426_s3, [#allocation3], %s342_s20, %s342_s20, %s343_s21  }
 0x288   :  { %v193_v41 = vpop.xlane.xlu0 %192 }
 0x289   :  { %309 = vlog2.f32 %v193_v41 }
 0x28c   :  { %v195_v42 = vpop.xlane.xlu1 %194  ;;  %v215_v45 = vpop.xlane.xlu0 %214 }
 0x28d   :  { %311 = vlog2.f32 %v195_v42 }
 0x290   :  { %v217_v51 = vpop.xlane.xlu0 %216 }
 0x293   :  { %v310_v43 = vpop.eup %309 }
 0x294   :  { %v197_v44 = vmul.f32 0.6931472, %v310_v43 }
 0x296   :  { %v200_v46 = vadd.f32 %v197_v44, %v183_v29 }
 0x297   :  { %v312_v47 = vpop.eup %311 }
 0x298   :  { %v220_v48 = vsub.f32 %v200_v46, %v215_v45  ;;  %v199_v49 = vmul.f32 0.6931472, %v312_v47 }
 0x29a   :  { %225 = vst.msk [vmem:[%s427_s4] sm:$0xff] %vm224_vm13, %v220_v48  ;;  %v201_v50 = vadd.f32 %v199_v49, %v185_v32 }
 0x29c   :  { %v221_v52 = vsub.f32 %v201_v50, %v217_v51 }
 0x29e   :  { %226 = vst.msk [vmem:[%s427_s4 + $0x8] sm:$0xff] %vm224_vm13, %v221_v52 }
 0x29f   :  { %335 = dma.done.wait [#allocation3], 256  }
 0x2a0   :  { %336 = vsyncadd [#allocation3], 4294967040 }
 0x2a1   :  { %246 = vsyncpa [#allocation3], 1 }

</bundles_post_ra>
